<compile_context>
chip_gen: v7x
topology: tpu7x:2x2x1
jax: 0.10.0
libtpu: 0.0.40
codegen_flags: <defaults>
</compile_context>

<pallas_src>
import math

import jax
import jax.numpy as jnp
from jax.experimental import pallas as pl
from jax.experimental.pallas import tpu as pltpu


def _build_pe_table(dim_model: int, max_len: int = 5000) -> jnp.ndarray:
    """Deterministic sinusoidal table, identical to the PyTorch __init__."""
    assert dim_model % 2 == 0, "sinusoidal PE requires an even d_model"
    position = jnp.arange(0, max_len, dtype=jnp.float32)[:, None]            # (maxLen, 1)
    div_term = jnp.exp(
        jnp.arange(0, dim_model, 2, dtype=jnp.float32)
        * -(math.log(10000.0) / dim_model)
    )                                                                          # (dim_model//2,)
    pe = jnp.zeros((max_len, dim_model), dtype=jnp.float32)
    pe = pe.at[:, 0::2].set(jnp.sin(position * div_term))
    pe = pe.at[:, 1::2].set(jnp.cos(position * div_term))
    return pe[None, :, :]                                                      # (1, maxLen, dimModel)


def _pe_add_kernel(x_ref, pe_ref, o_ref):
    # Pure VPU elementwise add. pe is f32; do the add in f32 (PyTorch parity),
    # cast on store. Works for both the 3-D (1, TS, D) blocks (same shape) and
    # the flattened 2-D blocks where pe (1, F) sublane-broadcasts against (B, F).
    o_ref[...] = (x_ref[...].astype(jnp.float32) + pe_ref[...]).astype(o_ref.dtype)


def _pick_seq_tile(S: int, D: int, itemsize: int,
                   vmem_block_budget_bytes: int = 20 << 20) -> int:
    """Largest sequence tile keeping (x + out)@x.dtype + pe@f32, double-buffered, under budget."""
    gran = max(8, 32 // max(1, itemsize))             # sublane granularity per dtype
    per_row_bytes = 4 * D * itemsize + 8 * D          # 2*(x) + 2*(out) + 2*(pe f32)
    ts = vmem_block_budget_bytes // per_row_bytes
    ts = max(gran, min(2048, (ts // gran) * gran))    # clamp to [gran, 2048]
    s_padded = ((S + gran - 1) // gran) * gran        # never exceed (padded) S
    return min(ts, s_padded)


def _pick_flat_tile(B: int, F: int, itemsize: int,
                    vmem_block_budget_bytes: int = 20 << 20) -> int:
    """Largest lane-dense (multiple-of-128) tile of the flattened S*D axis under budget."""
    per_col_bytes = 4 * B * itemsize + 8              # 2*(x) + 2*(out) @ B rows + 2*(pe f32) @ 1 row
    ft = vmem_block_budget_bytes // per_col_bytes
    ft = max(128, (ft // 128) * 128)
    return F if ft >= F else ft                       # full-extent block is always legal


def _forward_tiled(x, pe_f32, B, S, D, seq_tile, donate_x):
    """3-D path: D is lane-dense already (multiple of 128) or caller forced it."""
    if seq_tile is None:
        seq_tile = _pick_seq_tile(S, D, jnp.dtype(x.dtype).itemsize)
    num_s_tiles = pl.cdiv(S, seq_tile)
    kwargs = {"input_output_aliases": {0: 0}} if donate_x else {}
    return pl.pallas_call(
        _pe_add_kernel,
        out_shape=jax.ShapeDtypeStruct((B, S, D), x.dtype),
        # Batch is the INNERMOST grid axis: the pe block index (0, s, 0) does not
        # change across it, so the PE tile stays resident and is not re-DMA'd.
        grid=(num_s_tiles, B),
        in_specs=[
            pl.BlockSpec((1, seq_tile, D), lambda s, b: (b, s, 0)),   # x
            pl.BlockSpec((1, seq_tile, D), lambda s, b: (0, s, 0)),   # pe (resident over b)
        ],
        out_specs=pl.BlockSpec((1, seq_tile, D), lambda s, b: (b, s, 0)),
        compiler_params=pltpu.CompilerParams(
            dimension_semantics=("parallel", "parallel"),   # both independent -> megacore sharding
            vmem_limit_bytes=32 * 1024 * 1024,
        ),
        **kwargs,
    )(x, pe_f32)


def _forward_flat(x, pe_f32, B, S, D, donate_x):
    """Lane-dense path for D % 128 != 0: flatten (S, D) -> S*D and tile in 128-multiples."""
    F = S * D
    x_flat = x.reshape(B, F)
    pe_flat = pe_f32[:, :S, :].reshape(1, F)                 # (1, S*D), tiny extra HBM pass
    f_tile = _pick_flat_tile(B, F, jnp.dtype(x.dtype).itemsize)
    num_f_tiles = pl.cdiv(F, f_tile)
    kwargs = {"input_output_aliases": {0: 0}} if donate_x else {}
    out_flat = pl.pallas_call(
        _pe_add_kernel,
        out_shape=jax.ShapeDtypeStruct((B, F), x.dtype),
        grid=(num_f_tiles,),
        in_specs=[
            pl.BlockSpec((B, f_tile), lambda f: (0, f)),     # x: full batch, lane-dense tile
            pl.BlockSpec((1, f_tile), lambda f: (0, f)),     # pe: broadcast over batch in-kernel
        ],
        out_specs=pl.BlockSpec((B, f_tile), lambda f: (0, f)),
        compiler_params=pltpu.CompilerParams(
            dimension_semantics=("parallel",),
            vmem_limit_bytes=32 * 1024 * 1024,
        ),
        **kwargs,
    )(x_flat, pe_flat)
    return out_flat.reshape(B, S, D)


def positional_encoding_forward(x: jnp.ndarray, pe: jnp.ndarray,
                                seq_tile: int | None = None,
                                lane_dense_flatten: bool | None = None,
                                donate_x: bool = False) -> jnp.ndarray:
    """x: (B, S, D); pe: (1, maxLen, D). Returns x + pe[:, :S] (PyTorch forward)."""
    B, S, D = x.shape
    _, max_len, d_pe = pe.shape
    assert d_pe == D, "PE table feature dim must match x"
    assert S <= max_len, "sequence length exceeds maxLen of the PE table"

    pe_f32 = pe.astype(jnp.float32)   # keep PE in f32; add happens in f32 (PyTorch parity)

    if lane_dense_flatten is None:
        lane_dense_flatten = (D % 128 != 0)

    if lane_dense_flatten:
        return _forward_flat(x, pe_f32, B, S, D, donate_x)
    return _forward_tiled(x, pe_f32, B, S, D, seq_tile, donate_x)


if __name__ == "__main__":
    MAX_LEN = 5000

    # Case 1: toy shape from the spec (D=32 -> lane-dense flattened path).
    B, S, D = 2, 8, 32
    x = jax.random.normal(jax.random.PRNGKey(0), (B, S, D), dtype=jnp.float32)
    pe = _build_pe_table(D, MAX_LEN)
    out = jax.block_until_ready(positional_encoding_forward(x, pe))
    ref = x + pe[:, :S]
    assert out.shape == (B, S, D)
    assert jnp.allclose(out, ref, atol=1e-6, rtol=1e-6)

    # Case 2: D multiple of 128 -> 3-D tiled path with batch-innermost grid
    # (PE tile resident across the batch axis).
    B2, S2, D2 = 2, 16, 128
    x2 = jax.random.normal(jax.random.PRNGKey(0), (B2, S2, D2), dtype=jnp.float32)
    pe2 = _build_pe_table(D2, MAX_LEN)
    out2 = jax.block_until_ready(positional_encoding_forward(x2, pe2))
    ref2 = x2 + pe2[:, :S2]
    assert out2.shape == (B2, S2, D2)
    assert jnp.allclose(out2, ref2, atol=1e-6, rtol=1e-6)

    print("KERNEL_OK")
</pallas_src>

<mosaic_0001>
module attributes {stable_mosaic.version = 11 : i64} {
  func.func @_pe_add_kernel(%arg0: i32, %arg1: memref<2x256xf32, #tpu.memory_space<vmem>>, %arg2: memref<1x256xf32, #tpu.memory_space<vmem>>, %arg3: memref<2x256xf32, #tpu.memory_space<vmem>>) attributes {dimension_semantics = [#tpu.dimension_semantics<parallel>], iteration_bounds = array<i64: 1>, scalar_prefetch = 0 : i64, scratch_operands = 0 : i64, tpu.core_type = #tpu.core_type<tc>, window_params = [{transform_indices = @transform_0, window_bounds = array<i64: 2, 256>}, {transform_indices = @transform_1, window_bounds = array<i64: 1, 256>}, {transform_indices = @transform_2, window_bounds = array<i64: 2, 256>}]} {
    %c0 = arith.constant 0 : index
    %c0_0 = arith.constant 0 : index
    %0 = vector.load %arg1[%c0, %c0_0] : memref<2x256xf32, #tpu.memory_space<vmem>>, vector<2x256xf32>
    %c0_1 = arith.constant 0 : index
    %c0_2 = arith.constant 0 : index
    %1 = vector.load %arg2[%c0_1, %c0_2] : memref<1x256xf32, #tpu.memory_space<vmem>>, vector<1x256xf32>
    %2 = vector.broadcast %1 : vector<1x256xf32> to vector<2x256xf32>
    %3 = arith.addf %0, %2 : vector<2x256xf32>
    %c0_3 = arith.constant 0 : index
    %c0_4 = arith.constant 0 : index
    %4 = vector.load %arg3[%c0_3, %c0_4] : memref<2x256xf32, #tpu.memory_space<vmem>>, vector<2x256xf32>
    tpu.vector_store %arg3[%c0_3, %c0_4], %3 {strides = array<i32>} : memref<2x256xf32, #tpu.memory_space<vmem>>, vector<2x256xf32>,
    return
  }
  func.func @transform_0(%arg0: i32) -> (i32, i32) {
    %c0_i32 = arith.constant 0 : i32
    %c0_i32_0 = arith.constant 0 : i32
    return %c0_i32, %arg0 : i32, i32
  }
  func.func @transform_1(%arg0: i32) -> (i32, i32) {
    %c0_i32 = arith.constant 0 : i32
    %c0_i32_0 = arith.constant 0 : i32
    return %c0_i32, %arg0 : i32, i32
  }
  func.func @transform_2(%arg0: i32) -> (i32, i32) {
    %c0_i32 = arith.constant 0 : i32
    %c0_i32_0 = arith.constant 0 : i32
    return %c0_i32, %arg0 : i32, i32
  }
}

</mosaic_0001>

<bundles_post_ra>
// kernel: tpu_custom_call.1
= control target key start
LH: loop header
LB: loop body
LE: loop exit
PB: predicated region body
PF: predicated region fallthrough
CT: control target
= control target key end

     0   :  { %7 = vsyncpa [#allocation3], 0  ;;  %s157_s0 = inlined_call_operand.hbm [shape: f32[2,256], index: 0, kind: input, shape index: {}]   ;;  %s158_s1 = inlined_call_operand.vmem [shape: f32[1,256], index: 1, kind: input, shape index: {}]   ;;  %s159_s2 = inlined_call_operand.hbm [shape: f32[2,256], index: 2, kind: output, shape index: {}]  }
   0x1   :  { %8 = vsyncpa [#allocation4], 0  ;;  %s112_s9 = smov [#allocation2]   ;;  %s64_s13 = scalar_lea.hbm %s157_s0, 64 }
   0x2   :  { %s15_s10 = sshll.u32 %s112_s9, 4  ;;  %p65_p0 = scmp.ne.s32.totalorder %s157_s0, %s64_s13  ;;  %s16_s10 = int_to_ptr.vmem [resolvable:$true] %s15_s10 }
   0x3   :  { %p68_p1 = scmp.lt.u32.totalorder %s64_s13, %s157_s0 }
   0x5   :  { %p70_p2 = pnand %p68_p1, %p65_p0 }
   0x7   :  { %73 = shalt.err (!%p70_p2)
}
   0x8   :  { %s74_s18 = scalar_lea.vmem %s16_s10, 64  ;;  %p79_p4 = scmp.lt.s32.totalorder %s16_s10, %s16_s10 }
   0x9   :  { %p75_p3 = scmp.ne.s32.totalorder %s16_s10, %s74_s18  ;;  %p80_p5 = scmp.lt.s32.totalorder %s74_s18, %s74_s18 }
   0xb   :  { %p81_p6 = por %p80_p5, %p79_p4 }
   0xd   :  { %p82_p7 = pnand %p81_p6, %p75_p3 }
   0xf   :  { %85 = shalt.err (!%p82_p7)
}
  0x10   :  { %18 = dma.hbm_to_vmem [thread:$0]  %s157_s0, 64, %s16_s10, [#allocation3]  }
  0x11   :  { %108 = dma.done.wait [#allocation3], 64  }
  0x12   :  { %109 = vsyncadd [#allocation3], 4294967232  ;;  %v27_v0 = vlaneseq  ;;  %v113_v1 = vmov 1983009808   ;;  %v25_v7 = vld [vmem:[%s158_s1] sm:$0x3] }
  0x13   :  { %v37_v2 = vunpack.c.l.s4 %v113_v1  ;;  %v24_v12 = vld [vmem:[#allocation2] sm:$0xf]  ;;  %s114_s23 = smov [#allocation5]  }
  0x14   :  { %v28_v3 = vshrl.u32 %v27_v0, 7  ;;  %s52_s0 = sshll.u32 %s114_s23, 4  ;;  %s53_s0 = int_to_ptr.vmem [resolvable:$true] %s52_s0 }
  0x15   :  { %v38_v6 = vunpack.c.0.s8 %v37_v2  ;;  %s86_s24 = scalar_lea.vmem %s53_s0, 64  ;;  %p91_p9 = scmp.lt.s32.totalorder %s53_s0, %s53_s0 }
  0x16   :  { %v29_v4 = vsub.s32 0, %v28_v3  ;;  %v33_v5 = vsub.s32 1, %v28_v3  ;;  %p87_p8 = scmp.ne.s32.totalorder %s53_s0, %s86_s24  ;;  %p92_p10 = scmp.lt.s32.totalorder %s86_s24, %s86_s24 }
  0x17   :  { %v41_v10 = vsub.s32 %v38_v6, %v28_v3 }
  0x18   :  { %v30_v8 = vrot.slane %v25_v7, %v29_v4  ;;  %v34_v9 = vrot.slane %v25_v7, %v33_v5  ;;  %p93_p11 = por %p92_p10, %p91_p9 }
  0x1a   :  { %v35_v11 = vcombine.low %v30_v8, %v34_v9  ;;  %p94_p12 = pnand %p93_p11, %p87_p8 }
  0x1c   :  { %v42_v13 = vrot.slane %v35_v11, %v41_v10 }
  0x1e   :  { %v44_v14 = vadd.f32 %v42_v13, %v24_v12 }
  0x20   :  { %45 = vst [vmem:[#allocation5] sm:$0xf] %v44_v14 }
  0x21   :  { %97 = shalt.err (!%p94_p12)
}
  0x22   :  { %s98_s26 = scalar_lea.hbm %s159_s2, 64 }
  0x23   :  { %p99_p13 = scmp.ne.s32.totalorder %s159_s2, %s98_s26  ;;  %p102_p0 = scmp.lt.u32.totalorder %s98_s26, %s159_s2 }
  0x25   :  { %p104_p1 = pnand %p102_p0, %p99_p13 }
  0x27   :  { %107 = shalt.err (!%p104_p1)
}
  0x28   :  { %55 = dma.vmem_to_hbm [thread:$0]  %s53_s0, 64, %s159_s2, [#allocation4]  }
  0x29   :  { %110 = dma.done.wait [#allocation4], 64  }
  0x2a   :  { %111 = vsyncadd [#allocation4], 4294967232 }
  0x2b   :  { %59 = vsyncpa [#allocation3], 1 }
  0x2c   :  { %60 = vsyncpa [#allocation4], 1 }

</bundles_post_ra>
